<compile_context>
chip_gen: v6e
topology: v6e:2x2x1
jax: 0.10.0
libtpu: 0.0.40
codegen_flags: <defaults>
</compile_context>

<pallas_src>
import jax
import jax.numpy as jnp
from jax import lax
from jax.experimental import pallas as pl
from jax.experimental.pallas import tpu as pltpu


# ---------------------------------------------------------------------------
# Per-core VMEM budget -- used to size tiles and vmem_limit_bytes.
# ---------------------------------------------------------------------------
def _vmem_budget_bytes():
    try:
        cap = int(pltpu.get_tpu_info().vmem_capacity_bytes)
    except Exception:
        cap = 64 * 1024 * 1024            # conservative (v7x-sized) fallback
    return max(int(cap * 0.8), 32 * 1024 * 1024)


# ---------------------------------------------------------------------------
# Path 1: lane-fused GEMM kernel    out = relu(W @ x + shift)
#   x_ref: (K, Lb)  w_ref: (Cout, K)  shift_ref: (Cout, 1)  o_ref: (Cout, Lb)
# ---------------------------------------------------------------------------
def _gemm_bn_relu_kernel(x_ref, w_ref, shift_ref, o_ref):
    acc = jnp.dot(w_ref[...], x_ref[...], preferred_element_type=jnp.float32)
    o_ref[...] = jnp.maximum(acc + shift_ref[...], 0.0).astype(o_ref.dtype)


def _pick_lane_block(L, K, Cout, isz_in, isz_out, budget):
    """Largest lane tile (multiple of 128) that fits the VMEM budget."""
    if L <= 128:
        return L                                    # full (tiny) extent
    fixed = 2 * Cout * K * isz_in + 2 * Cout * 4    # resident weights + shift (2 bufs)
    per_lane = 2 * (K * isz_in + Cout * isz_out)    # double-buffered x & out tiles
    avail = max(budget - fixed - (4 << 20), per_lane * 128)
    max_lane = max(avail // per_lane, 128)
    cands = [c for c in (8192, 4096, 2048, 1024, 512, 256, 128) if c <= max_lane]
    for c in cands:                                 # prefer an exact divisor (no masked tail)
        if L % c == 0:
            return c
    for c in cands:                                 # else accept a masked last tile
        if c <= L:
            return c
    return 128


def _gemm_bn_relu(x_cols, w2d, shift, out_dtype, budget):
    """x_cols: (N, K, L)  w2d: (Cout, K)  shift: (Cout, 1)  ->  (N, Cout, L)."""
    N, K, L = x_cols.shape
    Cout = w2d.shape[0]
    isz_in = jnp.dtype(x_cols.dtype).itemsize
    isz_out = jnp.dtype(out_dtype).itemsize

    lane = _pick_lane_block(L, K, Cout, isz_in, isz_out, budget)
    # Megacore / 2-TC chips: keep at least two grid steps when we can.
    if N * pl.cdiv(L, lane) < 2 and lane > 128:
        lane = max(128, (lane // 2) // 128 * 128)
    n_l = pl.cdiv(L, lane)

    fp = (2 * lane * (K * isz_in + Cout * isz_out)
          + 2 * Cout * K * isz_in + 2 * Cout * 4 + (4 << 20))
    vmem_lim = int(min(max(fp, 32 << 20), budget))

    cost = pl.CostEstimate(
        flops=2 * N * Cout * K * L,
        bytes_accessed=(N * (K * L * isz_in + Cout * L * isz_out)
                        + Cout * K * isz_in + Cout * 4),
        transcendentals=0)

    return pl.pallas_call(
        _gemm_bn_relu_kernel,
        out_shape=jax.ShapeDtypeStruct((N, Cout, L), out_dtype),
        grid_spec=pltpu.PrefetchScalarGridSpec(
            num_scalar_prefetch=0,
            grid=(N, n_l),
            in_specs=[
                pl.BlockSpec((pl.Squeezed(), K, lane), lambda n, l: (n, 0, l)),
                pl.BlockSpec((Cout, K), lambda n, l: (0, 0)),
                pl.BlockSpec((Cout, 1), lambda n, l: (0, 0)),
            ],
            out_specs=pl.BlockSpec((pl.Squeezed(), Cout, lane), lambda n, l: (n, 0, l)),
        ),
        compiler_params=pltpu.CompilerParams(
            dimension_semantics=("parallel", "parallel"),
            vmem_limit_bytes=vmem_lim),
        cost_estimate=cost,
    )(x_cols, w2d, shift)


# ---------------------------------------------------------------------------
# Path 2: windowed temporal conv kernel (no wrapper im2col, no padded copy).
#   x_ref: (Cin, T, HW)  w_ref: (kT, Cb, Cin)  shift_ref: (Cb, 1)
#   o_ref: (Cb, T_out, HW)
# ---------------------------------------------------------------------------
def _make_windowed_kernel(kT, stride, padding, T, T_out):
    def kernel(x_ref, w_ref, shift_ref, o_ref):
        shift = shift_ref[...]
        cb = o_ref.shape[0]
        hw = o_ref.shape[2]
        for t in range(T_out):                      # static unroll: all slices static
            acc = None
            for dt in range(kT):
                t_in = t * stride + dt - padding
                if 0 <= t_in < T:                   # zero-padding taps skipped statically
                    part = jnp.dot(w_ref[dt], x_ref[:, t_in, :],
                                   preferred_element_type=jnp.float32)
                    acc = part if acc is None else acc + part
            if acc is None:                         # fully-padded window (degenerate)
                acc = jnp.zeros((cb, hw), jnp.float32)
            o_ref[:, t, :] = jnp.maximum(acc + shift, 0.0).astype(o_ref.dtype)
    return kernel


def _windowed_conv_bn_relu(x4, w_g, shift, out_dtype, kT, stride, padding,
                           T_out, budget):
    """x4: (N, Cin, T, HW)  w_g: (kT, Cout, Cin) -> (N, Cout, T_out, HW) or None."""
    N, Cin, T, HW = x4.shape
    Cout = w_g.shape[1]
    isz_in = jnp.dtype(x4.dtype).itemsize
    isz_out = jnp.dtype(out_dtype).itemsize

    def footprint(cb):
        return (2 * Cin * T * HW * isz_in           # per-sample input slab (2 bufs)
                + 2 * cb * T_out * HW * isz_out     # output slab chunk (2 bufs)
                + 2 * kT * cb * Cin * isz_in        # weights (2 bufs)
                + 2 * cb * 4 + (4 << 20))

    # Cout chunk candidates (largest first); chunk must be the full Cout or a
    # multiple of 8 (second-minor dim of the weight block).
    cands = []
    for nc in range(1, Cout + 1):
        if Cout % nc == 0:
            cb = Cout // nc
            if cb == Cout or cb % 8 == 0:
                cands.append(cb)
    cout_blk = None
    for cb in cands:
        if footprint(cb) <= budget:
            cout_blk = cb
            break
    if cout_blk is None:
        return None                                 # caller falls back to im2col GEMM

    # Megacore / 2-TC chips: keep at least two grid steps when possible.
    if N * (Cout // cout_blk) < 2:
        for cb in cands:
            if cb < cout_blk and footprint(cb) <= budget:
                cout_blk = cb
                break
    n_c = Cout // cout_blk

    vmem_lim = int(min(max(footprint(cout_blk), 32 << 20), budget))
    cost = pl.CostEstimate(
        flops=2 * N * Cout * Cin * kT * T_out * HW,
        bytes_accessed=(N * (Cin * T * HW * isz_in + Cout * T_out * HW * isz_out)
                        + kT * Cout * Cin * isz_in + Cout * 4),
        transcendentals=0)

    kernel = _make_windowed_kernel(kT, stride, padding, T, T_out)
    return pl.pallas_call(
        kernel,
        out_shape=jax.ShapeDtypeStruct((N, Cout, T_out, HW), out_dtype),
        grid_spec=pltpu.PrefetchScalarGridSpec(
            num_scalar_prefetch=0,
            grid=(N, n_c),
            in_specs=[
                pl.BlockSpec((pl.Squeezed(), Cin, T, HW), lambda n, c: (n, 0, 0, 0)),
                pl.BlockSpec((kT, cout_blk, Cin), lambda n, c: (0, c, 0)),
                pl.BlockSpec((cout_blk, 1), lambda n, c: (c, 0)),
            ],
            out_specs=pl.BlockSpec((pl.Squeezed(), cout_blk, T_out, HW),
                                   lambda n, c: (n, c, 0, 0)),
        ),
        compiler_params=pltpu.CompilerParams(
            dimension_semantics=("parallel", "parallel"),
            vmem_limit_bytes=vmem_lim),
        cost_estimate=cost,
    )(x4, w_g, shift)


# ---------------------------------------------------------------------------
# Escape hatch (per-sample slab larger than VMEM budget): im2col + GEMM.
# ---------------------------------------------------------------------------
def _im2col_gemm_bn_relu(x4, w2d, shift, out_dtype, kT, stride, padding,
                         T_out, budget):
    N, Cin, T, HW = x4.shape
    Cout = w2d.shape[0]
    xp = x4
    if padding > 0:
        xp = jnp.pad(x4, ((0, 0), (0, 0), (padding, padding), (0, 0)))
    taps = [lax.slice_in_dim(xp, dt, dt + (T_out - 1) * stride + 1,
                             stride=stride, axis=2) for dt in range(kT)]
    x_win = jnp.stack(taps, axis=2)                 # (N, Cin, kT, T_out, HW)
    x_cols = x_win.reshape(N, Cin * kT, T_out * HW)
    out = _gemm_bn_relu(x_cols, w2d, shift, out_dtype, budget)
    return out.reshape(N, Cout, T_out, HW)


# ---------------------------------------------------------------------------
# Public forward:  conv(kT,1,1)/stride(s,1,1) -> BatchNorm3d(eval) -> ReLU
# ---------------------------------------------------------------------------
def conv_module_forward(x, w, gamma, beta, running_mean, running_var, *,
                        stride=1, padding=0, eps=1e-5,
                        compute_dtype=None, out_dtype=None):
    """x: (N, Cin, T, H, W);  w: (Cout, Cin, kT, 1, 1) -> (N, Cout, T_out, H, W)."""
    N, Cin, T, H, W = x.shape
    Cout, Cin_w, kT, kh, kw = w.shape
    assert kh == 1 and kw == 1 and Cin_w == Cin, "convTx1x1 expects a (kT,1,1) kernel"
    HW = H * W
    T_out = (T + 2 * padding - kT) // stride + 1
    assert T_out >= 1

    cdt = jnp.dtype(compute_dtype) if compute_dtype is not None else jnp.dtype(x.dtype)
    odt = jnp.dtype(out_dtype) if out_dtype is not None else jnp.dtype(x.dtype)
    budget = _vmem_budget_bytes()

    # Eval-mode BatchNorm folded into the conv weights (exact, done in f32).
    inv_std = 1.0 / jnp.sqrt(running_var.astype(jnp.float32) + eps)
    scale = gamma.astype(jnp.float32) * inv_std                              # (Cout,)
    shift = (beta.astype(jnp.float32)
             - running_mean.astype(jnp.float32) * scale).reshape(Cout, 1)
    w_fold = w[:, :, :, 0, 0].astype(jnp.float32) * scale[:, None, None]     # (Cout, Cin, kT)

    x4 = x.reshape(N, Cin, T, HW)          # free reshape (contiguous), no copy
    if x4.dtype != cdt:
        x4 = x4.astype(cdt)                # optional bf16 compute path

    if kT == 1 and stride == 1 and padding == 0:
        # Pointwise: pure reshape handoff, big lane-fused GEMM.
        x_cols = x4.reshape(N, Cin, T * HW)
        w2d = w_fold[:, :, 0].astype(cdt)
        out = _gemm_bn_relu(x_cols, w2d, shift, odt, budget)
        out = out.reshape(N, Cout, T_out, HW)
    else:
        w_g = jnp.transpose(w_fold, (2, 0, 1)).astype(cdt)   # (kT, Cout, Cin)
        out = _windowed_conv_bn_relu(x4, w_g, shift, odt, kT, stride, padding,
                                     T_out, budget)
        if out is None:
            w2d = w_fold.reshape(Cout, Cin * kT).astype(cdt)
            out = _im2col_gemm_bn_relu(x4, w2d, shift, odt, kT, stride, padding,
                                       T_out, budget)

    return out.reshape(N, Cout, T_out, H, W)


# ---------------------------------------------------------------------------
# Pure-JAX reference.
# ---------------------------------------------------------------------------
def _reference_forward(x, w, gamma, beta, running_mean, running_var,
                       *, stride, padding, eps=1e-5):
    y = lax.conv_general_dilated(
        x, w,
        window_strides=(stride, 1, 1),
        padding=((padding, padding), (0, 0), (0, 0)),
        dimension_numbers=("NCDHW", "OIDHW", "NCDHW"),
    )
    g = gamma.reshape(1, -1, 1, 1, 1)
    b = beta.reshape(1, -1, 1, 1, 1)
    m = running_mean.reshape(1, -1, 1, 1, 1)
    v = running_var.reshape(1, -1, 1, 1, 1)
    y = (y - m) / jnp.sqrt(v + eps) * g + b
    return jnp.maximum(y, 0.0)


if __name__ == "__main__":
    N, Cin, Cout = 2, 8, 16
    T, H, W = 8, 8, 8

    key = jax.random.PRNGKey(0)
    kx, kw1, kw2, kw3, kg, kb, km, kv = jax.random.split(key, 8)

    x = jax.random.normal(kx, (N, Cin, T, H, W), dtype=jnp.float32)
    gamma = jax.random.uniform(kg, (Cout,), minval=0.5, maxval=1.5)
    beta = jax.random.normal(kb, (Cout,)) * 0.1
    running_mean = jax.random.normal(km, (Cout,)) * 0.1
    running_var = jax.random.uniform(kv, (Cout,), minval=0.5, maxval=1.5)

    def check(out, ref, atol, rtol):
        assert out.shape == ref.shape, (out.shape, ref.shape)
        o32 = out.astype(jnp.float32)
        ok = jnp.allclose(o32, ref, atol=atol, rtol=rtol)
        assert bool(ok), float(jnp.max(jnp.abs(o32 - ref)))

    # Config 1: temporal fusion conv (kT=3, stride=2, padding=1) -> windowed path.
    w1 = jax.random.normal(kw1, (Cout, Cin, 3, 1, 1), dtype=jnp.float32) * 0.1
    out1 = jax.block_until_ready(conv_module_forward(
        x, w1, gamma, beta, running_mean, running_var, stride=2, padding=1))
    ref1 = _reference_forward(x, w1, gamma, beta, running_mean, running_var,
                              stride=2, padding=1)
    check(out1, ref1, 1e-4, 1e-4)

    # Config 2: pointwise 1x1x1 conv -> lane-fused GEMM path (zero wrapper copies).
    w2 = jax.random.normal(kw2, (Cout, Cin, 1, 1, 1), dtype=jnp.float32) * 0.1
    out2 = jax.block_until_ready(conv_module_forward(
        x, w2, gamma, beta, running_mean, running_var, stride=1, padding=0))
    ref2 = _reference_forward(x, w2, gamma, beta, running_mean, running_var,
                              stride=1, padding=0)
    check(out2, ref2, 1e-4, 1e-4)

    # Config 3: overlapping temporal conv (kT=3, stride=1, padding=1) -> windowed path.
    w3 = jax.random.normal(kw3, (Cout, Cin, 3, 1, 1), dtype=jnp.float32) * 0.1
    out3 = jax.block_until_ready(conv_module_forward(
        x, w3, gamma, beta, running_mean, running_var, stride=1, padding=1))
    ref3 = _reference_forward(x, w3, gamma, beta, running_mean, running_var,
                              stride=1, padding=1)
    check(out3, ref3, 1e-4, 1e-4)

    # Config 4: bf16 activation/weight path (f32 accumulate + f32 epilogue).
    x_bf = x.astype(jnp.bfloat16)
    out4 = jax.block_until_ready(conv_module_forward(
        x_bf, w1, gamma, beta, running_mean, running_var, stride=2, padding=1))
    ref4 = _reference_forward(x_bf.astype(jnp.float32), w1, gamma, beta,
                              running_mean, running_var, stride=2, padding=1)
    check(out4, ref4, 8e-2, 8e-2)

    print("KERNEL_OK")
</pallas_src>

<mosaic_0001>
module attributes {stable_mosaic.version = 11 : i64} {
  func.func @kernel(%arg0: i32, %arg1: i32, %arg2: memref<1x8x8x64xf32, #tpu.memory_space<vmem>>, %arg3: memref<3x16x8xf32, #tpu.memory_space<vmem>>, %arg4: memref<16x1xf32, #tpu.memory_space<vmem>>, %arg5: memref<1x16x4x64xf32, #tpu.memory_space<vmem>>) attributes {dimension_semantics = [#tpu.dimension_semantics<parallel>, #tpu.dimension_semantics<parallel>], iteration_bounds = array<i64: 2, 1>, scalar_prefetch = 0 : i64, scratch_operands = 0 : i64, tpu.core_type = #tpu.core_type<tc>, window_params = [{transform_indices = @transform_0, window_bounds = array<i64: 1, 8, 8, 64>}, {transform_indices = @transform_1, window_bounds = array<i64: 3, 16, 8>}, {transform_indices = @transform_2, window_bounds = array<i64: 16, 1>}, {transform_indices = @transform_3, window_bounds = array<i64: 1, 16, 4, 64>}]} {
    %c0 = arith.constant 0 : index
    %c0_0 = arith.constant 0 : index
    %0 = vector.load %arg4[%c0, %c0_0] : memref<16x1xf32, #tpu.memory_space<vmem>>, vector<16x1xf32>
    %c1 = arith.constant 1 : index
    %c0_1 = arith.constant 0 : index
    %c0_2 = arith.constant 0 : index
    %1 = vector.load %arg3[%c1, %c0_1, %c0_2] : memref<3x16x8xf32, #tpu.memory_space<vmem>>, vector<1x16x8xf32>
    %2 = vector.shape_cast %1 : vector<1x16x8xf32> to vector<16x8xf32>
    %c0_3 = arith.constant 0 : index
    %c0_4 = arith.constant 0 : index
    %c0_5 = arith.constant 0 : index
    %c0_6 = arith.constant 0 : index
    %3 = vector.load %arg2[%c0_3, %c0_4, %c0_5, %c0_6] : memref<1x8x8x64xf32, #tpu.memory_space<vmem>>, vector<1x8x1x64xf32>
    %4 = vector.shape_cast %3 : vector<1x8x1x64xf32> to vector<8x64xf32>
    %cst = arith.constant dense<0.000000e+00> : vector<16x64xf32>
    %5 = tpu.matmul %2, %4, %cst {dimension_numbers = #tpu.dot_dimension_numbers<[1], [0], [0], [1], [0, 0, 1, 1], [], []>} : vector<16x8xf32>, vector<8x64xf32>, vector<16x64xf32> -> vector<16x64xf32>
    %c2 = arith.constant 2 : index
    %c0_7 = arith.constant 0 : index
    %c0_8 = arith.constant 0 : index
    %6 = vector.load %arg3[%c2, %c0_7, %c0_8] : memref<3x16x8xf32, #tpu.memory_space<vmem>>, vector<1x16x8xf32>
    %7 = vector.shape_cast %6 : vector<1x16x8xf32> to vector<16x8xf32>
    %c0_9 = arith.constant 0 : index
    %c0_10 = arith.constant 0 : index
    %c1_11 = arith.constant 1 : index
    %c0_12 = arith.constant 0 : index
    %8 = vector.load %arg2[%c0_9, %c0_10, %c1_11, %c0_12] : memref<1x8x8x64xf32, #tpu.memory_space<vmem>>, vector<1x8x1x64xf32>
    %9 = vector.shape_cast %8 : vector<1x8x1x64xf32> to vector<8x64xf32>
    %cst_13 = arith.constant dense<0.000000e+00> : vector<16x64xf32>
    %10 = tpu.matmul %7, %9, %cst_13 {dimension_numbers = #tpu.dot_dimension_numbers<[1], [0], [0], [1], [0, 0, 1, 1], [], []>} : vector<16x8xf32>, vector<8x64xf32>, vector<16x64xf32> -> vector<16x64xf32>
    %11 = arith.addf %5, %10 : vector<16x64xf32>
    %12 = vector.broadcast %0 : vector<16x1xf32> to vector<16x64xf32>
    %13 = arith.addf %11, %12 : vector<16x64xf32>
    %cst_14 = arith.constant 0.000000e+00 : f32
    %14 = vector.broadcast %cst_14 : f32 to vector<16x64xf32>
    %15 = arith.maximumf %13, %14 : vector<16x64xf32>
    %c0_15 = arith.constant 0 : index
    %c0_16 = arith.constant 0 : index
    %c0_17 = arith.constant 0 : index
    %c0_18 = arith.constant 0 : index
    %16 = vector.load %arg5[%c0_15, %c0_16, %c0_17, %c0_18] : memref<1x16x4x64xf32, #tpu.memory_space<vmem>>, vector<1x16x1x64xf32>
    %17 = vector.shape_cast %16 : vector<1x16x1x64xf32> to vector<16x64xf32>
    %18 = vector.shape_cast %15 : vector<16x64xf32> to vector<1x16x1x64xf32>
    tpu.vector_store %arg5[%c0_15, %c0_16, %c0_17, %c0_18], %18 {strides = array<i32>} : memref<1x16x4x64xf32, #tpu.memory_space<vmem>>, vector<1x16x1x64xf32>,
    %c0_19 = arith.constant 0 : index
    %c0_20 = arith.constant 0 : index
    %c0_21 = arith.constant 0 : index
    %19 = vector.load %arg3[%c0_19, %c0_20, %c0_21] : memref<3x16x8xf32, #tpu.memory_space<vmem>>, vector<1x16x8xf32>
    %20 = vector.shape_cast %19 : vector<1x16x8xf32> to vector<16x8xf32>
    %c0_22 = arith.constant 0 : index
    %c0_23 = arith.constant 0 : index
    %c1_24 = arith.constant 1 : index
    %c0_25 = arith.constant 0 : index
    %21 = vector.load %arg2[%c0_22, %c0_23, %c1_24, %c0_25] : memref<1x8x8x64xf32, #tpu.memory_space<vmem>>, vector<1x8x1x64xf32>
    %22 = vector.shape_cast %21 : vector<1x8x1x64xf32> to vector<8x64xf32>
    %cst_26 = arith.constant dense<0.000000e+00> : vector<16x64xf32>
    %23 = tpu.matmul %20, %22, %cst_26 {dimension_numbers = #tpu.dot_dimension_numbers<[1], [0], [0], [1], [0, 0, 1, 1], [], []>} : vector<16x8xf32>, vector<8x64xf32>, vector<16x64xf32> -> vector<16x64xf32>
    %c1_27 = arith.constant 1 : index
    %c0_28 = arith.constant 0 : index
    %c0_29 = arith.constant 0 : index
    %24 = vector.load %arg3[%c1_27, %c0_28, %c0_29] : memref<3x16x8xf32, #tpu.memory_space<vmem>>, vector<1x16x8xf32>
    %25 = vector.shape_cast %24 : vector<1x16x8xf32> to vector<16x8xf32>
    %c0_30 = arith.constant 0 : index
    %c0_31 = arith.constant 0 : index
    %c2_32 = arith.constant 2 : index
    %c0_33 = arith.constant 0 : index
    %26 = vector.load %arg2[%c0_30, %c0_31, %c2_32, %c0_33] : memref<1x8x8x64xf32, #tpu.memory_space<vmem>>, vector<1x8x1x64xf32>
    %27 = vector.shape_cast %26 : vector<1x8x1x64xf32> to vector<8x64xf32>
    %cst_34 = arith.constant dense<0.000000e+00> : vector<16x64xf32>
    %28 = tpu.matmul %25, %27, %cst_34 {dimension_numbers = #tpu.dot_dimension_numbers<[1], [0], [0], [1], [0, 0, 1, 1], [], []>} : vector<16x8xf32>, vector<8x64xf32>, vector<16x64xf32> -> vector<16x64xf32>
    %29 = arith.addf %23, %28 : vector<16x64xf32>
    %c2_35 = arith.constant 2 : index
    %c0_36 = arith.constant 0 : index
    %c0_37 = arith.constant 0 : index
    %30 = vector.load %arg3[%c2_35, %c0_36, %c0_37] : memref<3x16x8xf32, #tpu.memory_space<vmem>>, vector<1x16x8xf32>
    %31 = vector.shape_cast %30 : vector<1x16x8xf32> to vector<16x8xf32>
    %c0_38 = arith.constant 0 : index
    %c0_39 = arith.constant 0 : index
    %c3 = arith.constant 3 : index
    %c0_40 = arith.constant 0 : index
    %32 = vector.load %arg2[%c0_38, %c0_39, %c3, %c0_40] : memref<1x8x8x64xf32, #tpu.memory_space<vmem>>, vector<1x8x1x64xf32>
    %33 = vector.shape_cast %32 : vector<1x8x1x64xf32> to vector<8x64xf32>
    %cst_41 = arith.constant dense<0.000000e+00> : vector<16x64xf32>
    %34 = tpu.matmul %31, %33, %cst_41 {dimension_numbers = #tpu.dot_dimension_numbers<[1], [0], [0], [1], [0, 0, 1, 1], [], []>} : vector<16x8xf32>, vector<8x64xf32>, vector<16x64xf32> -> vector<16x64xf32>
    %35 = arith.addf %29, %34 : vector<16x64xf32>
    %36 = vector.broadcast %0 : vector<16x1xf32> to vector<16x64xf32>
    %37 = arith.addf %35, %36 : vector<16x64xf32>
    %cst_42 = arith.constant 0.000000e+00 : f32
    %38 = vector.broadcast %cst_42 : f32 to vector<16x64xf32>
    %39 = arith.maximumf %37, %38 : vector<16x64xf32>
    %c0_43 = arith.constant 0 : index
    %c0_44 = arith.constant 0 : index
    %c1_45 = arith.constant 1 : index
    %c0_46 = arith.constant 0 : index
    %40 = vector.load %arg5[%c0_43, %c0_44, %c1_45, %c0_46] : memref<1x16x4x64xf32, #tpu.memory_space<vmem>>, vector<1x16x1x64xf32>
    %41 = vector.shape_cast %40 : vector<1x16x1x64xf32> to vector<16x64xf32>
    %42 = vector.shape_cast %39 : vector<16x64xf32> to vector<1x16x1x64xf32>
    tpu.vector_store %arg5[%c0_43, %c0_44, %c1_45, %c0_46], %42 {strides = array<i32>} : memref<1x16x4x64xf32, #tpu.memory_space<vmem>>, vector<1x16x1x64xf32>,
    %c0_47 = arith.constant 0 : index
    %c0_48 = arith.constant 0 : index
    %c0_49 = arith.constant 0 : index
    %43 = vector.load %arg3[%c0_47, %c0_48, %c0_49] : memref<3x16x8xf32, #tpu.memory_space<vmem>>, vector<1x16x8xf32>
    %44 = vector.shape_cast %43 : vector<1x16x8xf32> to vector<16x8xf32>
    %c0_50 = arith.constant 0 : index
    %c0_51 = arith.constant 0 : index
    %c3_52 = arith.constant 3 : index
    %c0_53 = arith.constant 0 : index
    %45 = vector.load %arg2[%c0_50, %c0_51, %c3_52, %c0_53] : memref<1x8x8x64xf32, #tpu.memory_space<vmem>>, vector<1x8x1x64xf32>
    %46 = vector.shape_cast %45 : vector<1x8x1x64xf32> to vector<8x64xf32>
    %cst_54 = arith.constant dense<0.000000e+00> : vector<16x64xf32>
    %47 = tpu.matmul %44, %46, %cst_54 {dimension_numbers = #tpu.dot_dimension_numbers<[1], [0], [0], [1], [0, 0, 1, 1], [], []>} : vector<16x8xf32>, vector<8x64xf32>, vector<16x64xf32> -> vector<16x64xf32>
    %c1_55 = arith.constant 1 : index
    %c0_56 = arith.constant 0 : index
    %c0_57 = arith.constant 0 : index
    %48 = vector.load %arg3[%c1_55, %c0_56, %c0_57] : memref<3x16x8xf32, #tpu.memory_space<vmem>>, vector<1x16x8xf32>
    %49 = vector.shape_cast %48 : vector<1x16x8xf32> to vector<16x8xf32>
    %c0_58 = arith.constant 0 : index
    %c0_59 = arith.constant 0 : index
    %c4 = arith.constant 4 : index
    %c0_60 = arith.constant 0 : index
    %50 = vector.load %arg2[%c0_58, %c0_59, %c4, %c0_60] : memref<1x8x8x64xf32, #tpu.memory_space<vmem>>, vector<1x8x1x64xf32>
    %51 = vector.shape_cast %50 : vector<1x8x1x64xf32> to vector<8x64xf32>
    %cst_61 = arith.constant dense<0.000000e+00> : vector<16x64xf32>
    %52 = tpu.matmul %49, %51, %cst_61 {dimension_numbers = #tpu.dot_dimension_numbers<[1], [0], [0], [1], [0, 0, 1, 1], [], []>} : vector<16x8xf32>, vector<8x64xf32>, vector<16x64xf32> -> vector<16x64xf32>
    %53 = arith.addf %47, %52 : vector<16x64xf32>
    %c2_62 = arith.constant 2 : index
    %c0_63 = arith.constant 0 : index
    %c0_64 = arith.constant 0 : index
    %54 = vector.load %arg3[%c2_62, %c0_63, %c0_64] : memref<3x16x8xf32, #tpu.memory_space<vmem>>, vector<1x16x8xf32>
    %55 = vector.shape_cast %54 : vector<1x16x8xf32> to vector<16x8xf32>
    %c0_65 = arith.constant 0 : index
    %c0_66 = arith.constant 0 : index
    %c5 = arith.constant 5 : index
    %c0_67 = arith.constant 0 : index
    %56 = vector.load %arg2[%c0_65, %c0_66, %c5, %c0_67] : memref<1x8x8x64xf32, #tpu.memory_space<vmem>>, vector<1x8x1x64xf32>
    %57 = vector.shape_cast %56 : vector<1x8x1x64xf32> to vector<8x64xf32>
    %cst_68 = arith.constant dense<0.000000e+00> : vector<16x64xf32>
    %58 = tpu.matmul %55, %57, %cst_68 {dimension_numbers = #tpu.dot_dimension_numbers<[1], [0], [0], [1], [0, 0, 1, 1], [], []>} : vector<16x8xf32>, vector<8x64xf32>, vector<16x64xf32> -> vector<16x64xf32>
    %59 = arith.addf %53, %58 : vector<16x64xf32>
    %60 = vector.broadcast %0 : vector<16x1xf32> to vector<16x64xf32>
    %61 = arith.addf %59, %60 : vector<16x64xf32>
    %cst_69 = arith.constant 0.000000e+00 : f32
    %62 = vector.broadcast %cst_69 : f32 to vector<16x64xf32>
    %63 = arith.maximumf %61, %62 : vector<16x64xf32>
    %c0_70 = arith.constant 0 : index
    %c0_71 = arith.constant 0 : index
    %c2_72 = arith.constant 2 : index
    %c0_73 = arith.constant 0 : index
    %64 = vector.load %arg5[%c0_70, %c0_71, %c2_72, %c0_73] : memref<1x16x4x64xf32, #tpu.memory_space<vmem>>, vector<1x16x1x64xf32>
    %65 = vector.shape_cast %64 : vector<1x16x1x64xf32> to vector<16x64xf32>
    %66 = vector.shape_cast %63 : vector<16x64xf32> to vector<1x16x1x64xf32>
    tpu.vector_store %arg5[%c0_70, %c0_71, %c2_72, %c0_73], %66 {strides = array<i32>} : memref<1x16x4x64xf32, #tpu.memory_space<vmem>>, vector<1x16x1x64xf32>,
    %c0_74 = arith.constant 0 : index
    %c0_75 = arith.constant 0 : index
    %c0_76 = arith.constant 0 : index
    %67 = vector.load %arg3[%c0_74, %c0_75, %c0_76] : memref<3x16x8xf32, #tpu.memory_space<vmem>>, vector<1x16x8xf32>
    %68 = vector.shape_cast %67 : vector<1x16x8xf32> to vector<16x8xf32>
    %c0_77 = arith.constant 0 : index
    %c0_78 = arith.constant 0 : index
    %c5_79 = arith.constant 5 : index
    %c0_80 = arith.constant 0 : index
    %69 = vector.load %arg2[%c0_77, %c0_78, %c5_79, %c0_80] : memref<1x8x8x64xf32, #tpu.memory_space<vmem>>, vector<1x8x1x64xf32>
    %70 = vector.shape_cast %69 : vector<1x8x1x64xf32> to vector<8x64xf32>
    %cst_81 = arith.constant dense<0.000000e+00> : vector<16x64xf32>
    %71 = tpu.matmul %68, %70, %cst_81 {dimension_numbers = #tpu.dot_dimension_numbers<[1], [0], [0], [1], [0, 0, 1, 1], [], []>} : vector<16x8xf32>, vector<8x64xf32>, vector<16x64xf32> -> vector<16x64xf32>
    %c1_82 = arith.constant 1 : index
    %c0_83 = arith.constant 0 : index
    %c0_84 = arith.constant 0 : index
    %72 = vector.load %arg3[%c1_82, %c0_83, %c0_84] : memref<3x16x8xf32, #tpu.memory_space<vmem>>, vector<1x16x8xf32>
    %73 = vector.shape_cast %72 : vector<1x16x8xf32> to vector<16x8xf32>
    %c0_85 = arith.constant 0 : index
    %c0_86 = arith.constant 0 : index
    %c6 = arith.constant 6 : index
    %c0_87 = arith.constant 0 : index
    %74 = vector.load %arg2[%c0_85, %c0_86, %c6, %c0_87] : memref<1x8x8x64xf32, #tpu.memory_space<vmem>>, vector<1x8x1x64xf32>
    %75 = vector.shape_cast %74 : vector<1x8x1x64xf32> to vector<8x64xf32>
    %cst_88 = arith.constant dense<0.000000e+00> : vector<16x64xf32>
    %76 = tpu.matmul %73, %75, %cst_88 {dimension_numbers = #tpu.dot_dimension_numbers<[1], [0], [0], [1], [0, 0, 1, 1], [], []>} : vector<16x8xf32>, vector<8x64xf32>, vector<16x64xf32> -> vector<16x64xf32>
    %77 = arith.addf %71, %76 : vector<16x64xf32>
    %c2_89 = arith.constant 2 : index
    %c0_90 = arith.constant 0 : index
    %c0_91 = arith.constant 0 : index
    %78 = vector.load %arg3[%c2_89, %c0_90, %c0_91] : memref<3x16x8xf32, #tpu.memory_space<vmem>>, vector<1x16x8xf32>
    %79 = vector.shape_cast %78 : vector<1x16x8xf32> to vector<16x8xf32>
    %c0_92 = arith.constant 0 : index
    %c0_93 = arith.constant 0 : index
    %c7 = arith.constant 7 : index
    %c0_94 = arith.constant 0 : index
    %80 = vector.load %arg2[%c0_92, %c0_93, %c7, %c0_94] : memref<1x8x8x64xf32, #tpu.memory_space<vmem>>, vector<1x8x1x64xf32>
    %81 = vector.shape_cast %80 : vector<1x8x1x64xf32> to vector<8x64xf32>
    %cst_95 = arith.constant dense<0.000000e+00> : vector<16x64xf32>
    %82 = tpu.matmul %79, %81, %cst_95 {dimension_numbers = #tpu.dot_dimension_numbers<[1], [0], [0], [1], [0, 0, 1, 1], [], []>} : vector<16x8xf32>, vector<8x64xf32>, vector<16x64xf32> -> vector<16x64xf32>
    %83 = arith.addf %77, %82 : vector<16x64xf32>
    %84 = vector.broadcast %0 : vector<16x1xf32> to vector<16x64xf32>
    %85 = arith.addf %83, %84 : vector<16x64xf32>
    %cst_96 = arith.constant 0.000000e+00 : f32
    %86 = vector.broadcast %cst_96 : f32 to vector<16x64xf32>
    %87 = arith.maximumf %85, %86 : vector<16x64xf32>
    %c0_97 = arith.constant 0 : index
    %c0_98 = arith.constant 0 : index
    %c3_99 = arith.constant 3 : index
    %c0_100 = arith.constant 0 : index
    %88 = vector.load %arg5[%c0_97, %c0_98, %c3_99, %c0_100] : memref<1x16x4x64xf32, #tpu.memory_space<vmem>>, vector<1x16x1x64xf32>
    %89 = vector.shape_cast %88 : vector<1x16x1x64xf32> to vector<16x64xf32>
    %90 = vector.shape_cast %87 : vector<16x64xf32> to vector<1x16x1x64xf32>
    tpu.vector_store %arg5[%c0_97, %c0_98, %c3_99, %c0_100], %90 {strides = array<i32>} : memref<1x16x4x64xf32, #tpu.memory_space<vmem>>, vector<1x16x1x64xf32>,
    return
  }
  func.func @transform_0(%arg0: i32, %arg1: i32) -> (i32, i32, i32, i32) {
    %c0_i32 = arith.constant 0 : i32
    %c0_i32_0 = arith.constant 0 : i32
    %c0_i32_1 = arith.constant 0 : i32
    %c0_i32_2 = arith.constant 0 : i32
    return %arg0, %c0_i32, %c0_i32_0, %c0_i32_1 : i32, i32, i32, i32
  }
  func.func @transform_1(%arg0: i32, %arg1: i32) -> (i32, i32, i32) {
    %c0_i32 = arith.constant 0 : i32
    %c0_i32_0 = arith.constant 0 : i32
    %c0_i32_1 = arith.constant 0 : i32
    return %c0_i32, %arg1, %c0_i32_0 : i32, i32, i32
  }
  func.func @transform_2(%arg0: i32, %arg1: i32) -> (i32, i32) {
    %c0_i32 = arith.constant 0 : i32
    %c0_i32_0 = arith.constant 0 : i32
    return %arg1, %c0_i32 : i32, i32
  }
  func.func @transform_3(%arg0: i32, %arg1: i32) -> (i32, i32, i32, i32) {
    %c0_i32 = arith.constant 0 : i32
    %c0_i32_0 = arith.constant 0 : i32
    %c0_i32_1 = arith.constant 0 : i32
    return %arg0, %arg1, %c0_i32, %c0_i32_0 : i32, i32, i32, i32
  }
}

</mosaic_0001>

<bundles_post_ra>
// kernel: tpu_custom_call.1
= control target key start
LH: loop header
LB: loop body
LE: loop exit
PB: predicated region body
PF: predicated region fallthrough
CT: control target
= control target key end

     0   :  { %8 = vsyncpa [#allocation3], 0  ;;  %s3147_s0 = inlined_call_operand.hbm [shape: f32[2,8,8,64], index: 0, kind: input, shape index: {}]   ;;  %s3148_s1 = inlined_call_operand.vmem [shape: f32[3,16,8], index: 1, kind: input, shape index: {}]   ;;  %s3149_s2 = inlined_call_operand.vmem [shape: f32[16,1], index: 2, kind: input, shape index: {}]   ;;  %s3150_s3 = inlined_call_operand.hbm [shape: f32[2,16,4,64], index: 3, kind: output, shape index: {}]  }
   0x1   :  { %10 = vsyncpa [#allocation3 + $0x1], 0 }
   0x2   :  { %11 = vsyncpa [#allocation4], 0 }
   0x3   :  { %13 = vsyncpa [#allocation4 + $0x1], 0  ;;  %s2557_s12 = smov 0   ;;  %s2559_s13 = smov 0  }
   0x4   :  { %s2561_s14 = smov 0   ;;  %s2563_s15 = smov 0  }
   0x5   :  { %s2565_s16 = smov 0   ;;  %s2567_s17 = smov 0  }
   0x6 LB: > { %s2205_s18 = sadd.s32 4294967295, %s2527_s17   ;;  %s2206_s19 = sadd.s32 4294967294, %s2527_s17   ;;  %s2527_s17 = sphi %s2567_s17, %s19_s17   ;;  %s2523_s16 = sphi %s2565_s16, %s3161_s16   ;;  %s2519_s15 = sphi %s2563_s15, %s3160_s15   ;;  %s2515_s14 = sphi %s2561_s14, %s3159_s14   ;;  %s2511_s13 = sphi %s2559_s13, %s3158_s13   ;;  %s2507_s12 = sphi %s2557_s12, %s3157_s12  }
   0x7   : > { %s31_s20 = sadd.s32 1, %s2523_s16  ;;  %s38_s21 = sadd.s32 1, %s2515_s14 }
   0x8   : > { %p33_p0 = scmp.ge.s32.totalorder %s31_s20, 2  ;;  %p45_p1 = scmp.ne.s32.totalorder %s2515_s14, %s2511_s13 }
   0x9   : > { %p46_p2 = scmp.eq.s32.totalorder %s2527_s17, 0  ;;  %p51_p3 = scmp.ne.s32.totalorder %s2511_s13, %s2507_s12 }
   0xa   : > { %s3163_s20 = smov (%p33_p0, %s31_s20), 0  ;;  %p52_p5 = scmp.eq.s32.totalorder %s2205_s18, 0 }
   0xb   : > { %p2598_p4 = por %p46_p2, %p45_p1  ;;  %s35_s23 = ssub.s32 %s2523_s16, %s3163_s20 }
   0xc   : > { %p129_p6 = scmp.eq.s32.totalorder %s2205_s18, 1  ;;  %p36_p7 = scmp.eq.s32.totalorder %s35_s23, 0 }
   0xd   : > { %p2604_p8 = por %p52_p5, %p51_p3  ;;  %p135_p10 = scmp.eq.s32.totalorder %s2206_s19, 1 }
   0xe   : > { %p2608_p9 = por %p129_p6, %p45_p1  ;;  %p2362_p13 = scmp.lt.s32.totalorder %s2527_s17, 2 }
   0xf   : > { %s2613_s26 = scalar_select %p36_p7, %s2515_s14, %s38_s21  }
  0x10   : > { %p2615_p11 = por %p135_p10, %p51_p3  ;;  %s173_s28 = sand.u32 1, %s2515_s14  }
  0x11   : > { %s2211_s29 = sshll.u32 %s173_s28, 6  ;;  %s2260_s30 = sshll.u32 %s2523_s16, 10 }
  0x12   : > { %s183_s6 = scalar_lea.hbm %s3147_s0, %s2260_s30  ;;  %s177_s7 = scalar_lea.vmem [#allocation2], %s2211_s29 }
  0x13   : > { %s184_s8 = sshll.u32 %s177_s7, 4  ;;  %p2628_p0 = pnand %p2362_p13, %p2598_p4  ;;  %s185_s8 = int_to_ptr.vmem [resolvable:$true] %s184_s8 }
  0x14   : > { %p2214_p1 = scmp.ge.s32.totalorder %s2527_s17, 1  ;;  %s174_s10 = scalar_lea.sflag [#allocation3], %s173_s28 }
  0x15   : > { %p2421_p2 = pneg %p2628_p0  ;;  %s2432_s11 = scalar_lea.vmem %s185_s8, 1024 }
  0x16   : > { %p2433_p3 = scmp.ne.s32.totalorder %s185_s8, %s2432_s11  ;;  %s2529_s18 = smov [#allocation2]  }
  0x17   : > { %s2437_s19 = sshll.u32 %s2529_s18, 4  ;;  %s2438_s19 = int_to_ptr.vmem [resolvable:$false] %s2437_s19 }
  0x18   : > { %p2435_p5 = pnand %p2433_p3, %p2421_p2  ;;  %s2439_s21 = scalar_lea.vmem %s2438_s19, 2048 }
  0x19   : > { %p2440_p7 = scmp.lt.s32.totalorder %s185_s8, %s2438_s19  ;;  %p2441_p10 = scmp.lt.s32.totalorder %s2439_s21, %s2432_s11 }
  0x1a   : > { %p2436_p6 = pneg %p2435_p5 }
  0x1b   : > { %p2442_p12 = por %p2441_p10, %p2440_p7 }
  0x1d   : > { %p2443_p4 = pnand %p2442_p12, %p2436_p6 }
  0x1f   : > { %2446 = shalt.err (!%p2443_p4)
}
  0x20   : > { %s2530_s22 = smov 128   ;;  %s2531_s23 = smov 8  }
  0x21   : > { %2357 = dma.hbm_to_vmem [thread:$0]  (!%p2628_p0), %s183_s6, 1024, %s185_s8, %s174_s10, %s2530_s22, %s2530_s22, %s2531_s23  }
  0x22   : > { %p192_p13 = scmp.lt.s32.totalorder %s2527_s17, 3 }
  0x24   : > { %p193_p2 = pnand %p2214_p1, %p192_p13 }
  0x25   : > { %s2641_s28 = sand.u32 (!%p193_p2), 1, %s2511_s13  }
  0x26   : > { %196 = sbr.rel (%p193_p2) target bundleno = 327 (0x147), region = 32  ;;  %s2215_s29 = sshll.u32 (!%p193_p2), %s2641_s28, 6 }
  0x27   : > { %s199_s30 = scalar_lea.sflag (!%p193_p2), [#allocation3], %s2641_s28  ;;  %s2647_s4 = scalar_lea.vmem (!%p193_p2), [#allocation2], %s2215_s29 }
  0x2b   : > { %2498 = dma.done.wait (%p2604_p8), %s199_s30, 1024  }
  0x2c   : > { %2500 = vsyncadd (%p2604_p8), %s199_s30, 4294966272  ;;  %v2532_v0 = vmov 0   ;;  %vm281_vm0 = vcmask 1041409   ;;  %vm284_vm1 = vcmask 1042434   ;;  %vm287_vm2 = vcmask 1043459   ;;  %v2668_v20 = vld [vmem:[%s3148_s1 + $0x20] sm:$0xff] }
  0x2d   : > { %2418 = vset.pattern.permute.xlu0 %v2532_v0  ;;  %vm290_vm3 = vcmask 1044484   ;;  %vm293_vm4 = vcmask 1045509   ;;  %vm296_vm5 = vcmask 1046534   ;;  %vm299_vm6 = vcmask 1047559   ;;  %v264_v1 = vld [vmem:[%s2647_s4 + $0x1] sm:$0x1] }
  0x2e   : > { %vm302_vm7 = vcmask 64512   ;;  %v265_v2 = vld [vmem:[%s2647_s4 + $0x9] sm:$0x1]  ;;  %v266_v3 = vld [vmem:[%s2647_s4 + $0x11] sm:$0x1]  ;;  %v2712_v58 = vld [vmem:[%s3148_s1 + $0x18] sm:$0xff] }
  0x2f   : > { %v267_v4 = vld [vmem:[%s2647_s4 + $0x19] sm:$0x1]  ;;  %v268_v5 = vld [vmem:[%s2647_s4 + $0x21] sm:$0x1]  ;;  %v269_v6 = vld [vmem:[%s2647_s4 + $0x29] sm:$0x1]  ;;  %2297 = vmatprep.mubr.msk.f32.mxu0 %vm302_vm7, %v2668_v20 }
  0x30   : > { %v270_v7 = vld [vmem:[%s2647_s4 + $0x31] sm:$0x1]  ;;  %v271_v8 = vld [vmem:[%s2647_s4 + $0x39] sm:$0x1]  ;;  %v280_v9 = vrot.slane %v265_v2, 7  ;;  %v283_v10 = vrot.slane %v266_v3, 6 }
  0x31   : > { %v286_v11 = vrot.slane %v267_v4, 5  ;;  %v289_v12 = vrot.slane %v268_v5, 4  ;;  %v292_v13 = vrot.slane %v269_v6, 3  ;;  %v295_v14 = vrot.slane %v270_v7, 2  ;;  %v253_v15 = vld [vmem:[%s2647_s4] sm:$0x1] }
  0x32   : > { %v282_v16 = vsel %vm281_vm0, %v280_v9, %v264_v1  ;;  %v298_v17 = vrot.slane %v271_v8, 1  ;;  %v254_v18 = vld [vmem:[%s2647_s4 + $0x8] sm:$0x1]  ;;  %v255_v19 = vld [vmem:[%s2647_s4 + $0x10] sm:$0x1]  ;;  %v2724_v5 = vld [vmem:[%s3148_s1] sm:$0xff] }
  0x33   : > { %v285_v21 = vsel %vm284_vm1, %v283_v10, %v282_v16  ;;  %v256_v22 = vld [vmem:[%s2647_s4 + $0x18] sm:$0x1]  ;;  %v257_v23 = vld [vmem:[%s2647_s4 + $0x20] sm:$0x1]  ;;  %v258_v24 = vld [vmem:[%s2647_s4 + $0x28] sm:$0x1] }
  0x34   : > { %v288_v25 = vsel %vm287_vm2, %v286_v11, %v285_v21  ;;  %v259_v26 = vld [vmem:[%s2647_s4 + $0x30] sm:$0x1]  ;;  %v260_v27 = vld [vmem:[%s2647_s4 + $0x38] sm:$0x1]  ;;  %v392_v28 = vrot.slane %v254_v18, 7  ;;  %v394_v29 = vrot.slane %v255_v19, 6 }
  0x35   : > { %v291_v30 = vsel %vm290_vm3, %v289_v12, %v288_v25  ;;  %v396_v31 = vrot.slane %v256_v22, 5  ;;  %v398_v32 = vrot.slane %v257_v23, 4  ;;  %v400_v33 = vrot.slane %v258_v24, 3  ;;  %v2683_v34 = vld [vmem:[%s3148_s1 + $0x10] sm:$0xff]  ;;  %v2692_v39 = vld [vmem:[%s3148_s1 + $0x28] sm:$0xff]  ;;  %v248_v23 = vld [vmem:[%s3149_s2] sm:$0xff] }
  0x36   : > { %v294_v35 = vsel %vm293_vm4, %v292_v13, %v291_v30  ;;  %v393_v36 = vsel %vm281_vm0, %v392_v28, %v253_v15  ;;  %v402_v37 = vrot.slane %v259_v26, 2  ;;  %v404_v38 = vrot.slane %v260_v27, 1  ;;  %2302 = vmatprep.mubr.msk.f32.mxu1 %vm302_vm7, %v2683_v34  ;;  %v647_v40 = vld [vmem:[%s2647_s4 + $0x2] sm:$0x1]  ;;  %v648_v41 = vld [vmem:[%s2647_s4 + $0xa] sm:$0x1]  ;;  %490 = vperm.xlu0 %2418, %v248_v23  }
  0x37   : > { %v297_v42 = vsel %vm296_vm5, %v295_v14, %v294_v35  ;;  %v395_v43 = vsel %vm284_vm1, %v394_v29, %v393_v36  ;;  %v649_v44 = vld [vmem:[%s2647_s4 + $0x12] sm:$0x1]  ;;  %v650_v45 = vld [vmem:[%s2647_s4 + $0x1a] sm:$0x1]  ;;  %v651_v46 = vld [vmem:[%s2647_s4 + $0x22] sm:$0x1] }
  0x38   : > { %v300_v47 = vsel %vm299_vm6, %v298_v17, %v297_v42  ;;  %v397_v48 = vsel %vm287_vm2, %v396_v31, %v395_v43  ;;  %v652_v49 = vld [vmem:[%s2647_s4 + $0x2a] sm:$0x1]  ;;  %v653_v50 = vld [vmem:[%s2647_s4 + $0x32] sm:$0x1]  ;;  %v654_v51 = vld [vmem:[%s2647_s4 + $0x3a] sm:$0x1] }
  0x39   : > { %2295 = vmatprep.subr.mxu0 %v300_v47  ;;  %v399_v52 = vsel %vm290_vm3, %v398_v32, %v397_v48  ;;  %v663_v53 = vrot.slane %v648_v41, 7  ;;  %v665_v54 = vrot.slane %v649_v44, 6  ;;  %v667_v55 = vrot.slane %v650_v45, 5  ;;  %v637_v56 = vld [vmem:[%s2647_s4 + $0x1] sm:$0x1]  ;;  %v249_v42 = vld [vmem:[%s3149_s2 + $0x8] sm:$0xff] }
  0x3a   : > { %v401_v57 = vsel %vm293_vm4, %v400_v33, %v399_v52  ;;  %2296 = vmatpush3.msra.mxu0 %v300_v47  ;;  %v669_v59 = vrot.slane %v651_v46, 4  ;;  %v671_v60 = vrot.slane %v652_v49, 3  ;;  %v673_v61 = vrot.slane %v653_v50, 2  ;;  %v638_v62 = vld [vmem:[%s2647_s4 + $0x9] sm:$0x1]  ;;  %495 = vperm.xlu0 %2418, %v249_v42   ;;  %s2076_s9 = scalar_lea.sflag [#allocation4], %s2641_s28 }
  0x3b   : > { %v403_v63 = vsel %vm296_vm5, %v402_v37, %v401_v57  ;;  %2298 = vmatmul.mubr.msk.f32.vlgmr.msra.gmra.mxu0 %vm302_vm7, %v2692_v39  ;;  %v664_v0 = vsel %vm281_vm0, %v663_v53, %v647_v40  ;;  %v675_v1 = vrot.slane %v654_v51, 1  ;;  %v639_v2 = vld [vmem:[%s2647_s4 + $0x11] sm:$0x1]  ;;  %v640_v3 = vld [vmem:[%s2647_s4 + $0x19] sm:$0x1]  ;;  %v767_v4 = vrot.slane %v638_v62, 7 }
  0x3c   : > { %v405_v6 = vsel %vm299_vm6, %v404_v38, %v403_v63  ;;  %v666_v7 = vsel %vm284_vm1, %v665_v54, %v664_v0  ;;  %v641_v8 = vld [vmem:[%s2647_s4 + $0x21] sm:$0x1]  ;;  %v642_v9 = vld [vmem:[%s2647_s4 + $0x29] sm:$0x1]  ;;  %v643_v10 = vld [vmem:[%s2647_s4 + $0x31] sm:$0x1]  ;;  %2307 = vmatprep.mubr.msk.f32.mxu0 %vm302_vm7, %v2683_v34 }
  0x3d   : > { %2300 = vmatprep.subr.mxu1 %v405_v6  ;;  %v668_v11 = vsel %vm287_vm2, %v667_v55, %v666_v7  ;;  %v644_v12 = vld [vmem:[%s2647_s4 + $0x39] sm:$0x1]  ;;  %v768_v13 = vsel %vm281_vm0, %v767_v4, %v637_v56  ;;  %v769_v14 = vrot.slane %v639_v2, 6  ;;  %v771_v15 = vrot.slane %v640_v3, 5  ;;  %v865_v16 = vld [vmem:[%s2647_s4 + $0x3] sm:$0x1] }
  0x3e   : > { %2301 = vmatpush3.msra.mxu1 %v405_v6  ;;  %v670_v17 = vsel %vm290_vm3, %v669_v59, %v668_v11  ;;  %v773_v18 = vrot.slane %v641_v8, 4  ;;  %v775_v19 = vrot.slane %v642_v9, 3  ;;  %v777_v21 = vrot.slane %v643_v10, 2  ;;  %v866_v22 = vld [vmem:[%s2647_s4 + $0xb] sm:$0x1]  ;;  %s2534_s11 = smov [#allocation5]  }
  0x3f   : > { %2303 = vmatmul.mubr.msk.f32.vlgmr.msra.gmra.mxu1 %vm302_vm7, %v2712_v58  ;;  %v672_v24 = vsel %vm293_vm4, %v671_v60, %v670_v17  ;;  %v770_v25 = vsel %vm284_vm1, %v769_v14, %v768_v13  ;;  %v779_v26 = vrot.slane %v644_v12, 1  ;;  %v867_v27 = vld [vmem:[%s2647_s4 + $0x13] sm:$0x1]  ;;  %v868_v28 = vld [vmem:[%s2647_s4 + $0x1b] sm:$0x1]  ;;  %v881_v29 = vrot.slane %v866_v22, 7 }
  0x40   : > { %v674_v30 = vsel %vm296_vm5, %v673_v61, %v672_v24  ;;  %v772_v31 = vsel %vm287_vm2, %v771_v15, %v770_v25  ;;  %2312 = vmatprep.mubr.msk.f32.mxu1 %vm302_vm7, %v2724_v5  ;;  %v869_v32 = vld [vmem:[%s2647_s4 + $0x23] sm:$0x1]  ;;  %v870_v33 = vld [vmem:[%s2647_s4 + $0x2b] sm:$0x1]  ;;  %v871_v35 = vld [vmem:[%s2647_s4 + $0x33] sm:$0x1] }
  0x41   : > { %v676_v36 = vsel %vm299_vm6, %v675_v1, %v674_v30  ;;  %v774_v37 = vsel %vm290_vm3, %v773_v18, %v772_v31  ;;  %v872_v38 = vld [vmem:[%s2647_s4 + $0x3b] sm:$0x1]  ;;  %v882_v40 = vsel %vm281_vm0, %v881_v29, %v865_v16  ;;  %v883_v41 = vrot.slane %v867_v27, 6  ;;  %v2766_v44 = vld [vmem:[%s3148_s1 + $0x8] sm:$0xff]  ;;  %v1127_v48 = vld [vmem:[%s2647_s4 + $0x4] sm:$0x1] }
  0x42   : > { %2305 = vmatprep.subr.mxu0 %v676_v36  ;;  %v776_v43 = vsel %vm293_vm4, %v775_v19, %v774_v37  ;;  %v885_v45 = vrot.slane %v868_v28, 5  ;;  %v887_v46 = vrot.slane %v869_v32, 4  ;;  %v889_v47 = vrot.slane %v870_v33, 3  ;;  %v1128_v49 = vld [vmem:[%s2647_s4 + $0xc] sm:$0x1]  ;;  %s2451_s18 = sshll.u32 %s2534_s11, 4  ;;  %s2452_s18 = int_to_ptr.vmem [resolvable:$false] %s2451_s18 }
  0x43   : > { %2306 = vmatpush3.msra.mxu0 %v676_v36  ;;  %v778_v50 = vsel %vm296_vm5, %v777_v21, %v776_v43  ;;  %v884_v51 = vsel %vm284_vm1, %v883_v41, %v882_v40  ;;  %v891_v52 = vrot.slane %v871_v35, 2  ;;  %v893_v53 = vrot.slane %v872_v38, 1  ;;  %v1129_v54 = vld [vmem:[%s2647_s4 + $0x14] sm:$0x1]  ;;  %v1130_v55 = vld [vmem:[%s2647_s4 + $0x1c] sm:$0x1] }
  0x44   : > { %v780_v56 = vsel %vm299_vm6, %v779_v26, %v778_v50  ;;  %2308 = vmatmul.mubr.msk.f32.vlgmr.msra.gmra.mxu0 %vm302_vm7, %v2712_v58  ;;  %v886_v57 = vsel %vm287_vm2, %v885_v45, %v884_v51  ;;  %v1131_v59 = vld [vmem:[%s2647_s4 + $0x24] sm:$0x1]  ;;  %v1132_v60 = vld [vmem:[%s2647_s4 + $0x2c] sm:$0x1]  ;;  %v1133_v61 = vld [vmem:[%s2647_s4 + $0x34] sm:$0x1] }
  0x45   : > { %2310 = vmatprep.subr.mxu1 %v780_v56  ;;  %v888_v62 = vsel %vm290_vm3, %v887_v46, %v886_v57  ;;  %v1134_v63 = vld [vmem:[%s2647_s4 + $0x3c] sm:$0x1]  ;;  %v1143_v0 = vrot.slane %v1128_v49, 7  ;;  %v1145_v1 = vrot.slane %v1129_v54, 6  ;;  %v1147_v2 = vrot.slane %v1130_v55, 5  ;;  %2317 = vmatprep.mubr.msk.f32.mxu0 %vm302_vm7, %v2668_v20  ;;  %s2453_s19 = scalar_lea.vmem %s2452_s18, 2048 }
  0x46   : > { %2311 = vmatpush3.msra.mxu1 %v780_v56  ;;  %v890_v3 = vsel %vm293_vm4, %v889_v47, %v888_v62  ;;  %v1149_v4 = vrot.slane %v1131_v59, 4  ;;  %v1151_v6 = vrot.slane %v1132_v60, 3  ;;  %v1117_v7 = vld [vmem:[%s2647_s4 + $0x3] sm:$0x1]  ;;  %v1153_v10 = vrot.slane %v1133_v61, 2 }
  0x47   : > { %2313 = vmatmul.mubr.msk.f32.vlgmr.msra.gmra.mxu1 %vm302_vm7, %v2766_v44  ;;  %v892_v8 = vsel %vm296_vm5, %v891_v52, %v890_v3  ;;  %v1144_v9 = vsel %vm281_vm0, %v1143_v0, %v1127_v48  ;;  %v1155_v11 = vrot.slane %v1134_v63, 1  ;;  %v1118_v12 = vld [vmem:[%s2647_s4 + $0xb] sm:$0x1]  ;;  %v1119_v13 = vld [vmem:[%s2647_s4 + $0x13] sm:$0x1]  ;;  %vm618_vm8 = vcmask 516096  }
  0x48   : > { %v894_v14 = vsel %vm299_vm6, %v893_v53, %v892_v8  ;;  %v1146_v15 = vsel %vm284_vm1, %v1145_v1, %v1144_v9  ;;  %2322 = vmatprep.mubr.msk.f32.mxu1 %vm302_vm7, %v2683_v34  ;;  %v1120_v16 = vld [vmem:[%s2647_s4 + $0x1b] sm:$0x1]  ;;  %v1121_v17 = vld [vmem:[%s2647_s4 + $0x23] sm:$0x1]  ;;  %v1122_v18 = vld [vmem:[%s2647_s4 + $0x2b] sm:$0x1] }
  0x49   : > { %2315 = vmatprep.subr.mxu0 %v894_v14  ;;  %v1148_v19 = vsel %vm287_vm2, %v1147_v2, %v1146_v15  ;;  %v1123_v21 = vld [vmem:[%s2647_s4 + $0x33] sm:$0x1]  ;;  %v1124_v22 = vld [vmem:[%s2647_s4 + $0x3b] sm:$0x1]  ;;  %v1247_v23 = vrot.slane %v1118_v12, 7  ;;  %v1249_v24 = vrot.slane %v1119_v13, 6 }
  0x4a   : > { %2316 = vmatpush3.msra.mxu0 %v894_v14  ;;  %v1150_v25 = vsel %vm290_vm3, %v1149_v4, %v1148_v19  ;;  %v1251_v26 = vrot.slane %v1120_v16, 5  ;;  %v1253_v27 = vrot.slane %v1121_v17, 4  ;;  %v1255_v28 = vrot.slane %v1122_v18, 3  ;;  %v1345_v29 = vld [vmem:[%s2647_s4 + $0x5] sm:$0x1] }
  0x4b   : > { %v1152_v30 = vsel %vm293_vm4, %v1151_v6, %v1150_v25  ;;  %2318 = vmatmul.mubr.msk.f32.vlgmr.msra.gmra.mxu0 %vm302_vm7, %v2692_v39  ;;  %v1248_v31 = vsel %vm281_vm0, %v1247_v23, %v1117_v7  ;;  %v1257_v32 = vrot.slane %v1123_v21, 2  ;;  %v1259_v33 = vrot.slane %v1124_v22, 1  ;;  %v1346_v35 = vld [vmem:[%s2647_s4 + $0xd] sm:$0x1]  ;;  %v1347_v36 = vld [vmem:[%s2647_s4 + $0x15] sm:$0x1] }
  0x4c   : > { %v1154_v37 = vsel %vm296_vm5, %v1153_v10, %v1152_v30  ;;  %v1250_v38 = vsel %vm284_vm1, %v1249_v24, %v1248_v31  ;;  %v1348_v40 = vld [vmem:[%s2647_s4 + $0x1d] sm:$0x1]  ;;  %v1349_v41 = vld [vmem:[%s2647_s4 + $0x25] sm:$0x1]  ;;  %v1350_v42 = vld [vmem:[%s2647_s4 + $0x2d] sm:$0x1]  ;;  %2327 = vmatprep.mubr.msk.f32.mxu0 %vm302_vm7, %v2724_v5 }
  0x4d   : > { %v1156_v43 = vsel %vm299_vm6, %v1155_v11, %v1154_v37  ;;  %v1252_v45 = vsel %vm287_vm2, %v1251_v26, %v1250_v38  ;;  %v1351_v46 = vld [vmem:[%s2647_s4 + $0x35] sm:$0x1]  ;;  %v1352_v47 = vld [vmem:[%s2647_s4 + $0x3d] sm:$0x1]  ;;  %v1361_v48 = vrot.slane %v1346_v35, 7  ;;  %v1363_v49 = vrot.slane %v1347_v36, 6 }
  0x4e   : > { %2320 = vmatprep.subr.mxu1 %v1156_v43  ;;  %v1254_v50 = vsel %vm290_vm3, %v1253_v27, %v1252_v45  ;;  %v1365_v51 = vrot.slane %v1348_v40, 5  ;;  %v1367_v52 = vrot.slane %v1349_v41, 4  ;;  %v1369_v53 = vrot.slane %v1350_v42, 3  ;;  %v1607_v54 = vld [vmem:[%s2647_s4 + $0x6] sm:$0x1] }
  0x4f   : > { %2321 = vmatpush3.msra.mxu1 %v1156_v43  ;;  %v1256_v55 = vsel %vm293_vm4, %v1255_v28, %v1254_v50  ;;  %v1362_v56 = vsel %vm281_vm0, %v1361_v48, %v1345_v29  ;;  %v1371_v57 = vrot.slane %v1351_v46, 2  ;;  %v1373_v59 = vrot.slane %v1352_v47, 1  ;;  %v1608_v60 = vld [vmem:[%s2647_s4 + $0xe] sm:$0x1]  ;;  %v1609_v61 = vld [vmem:[%s2647_s4 + $0x16] sm:$0x1] }
  0x50   : > { %2323 = vmatmul.mubr.msk.f32.vlgmr.msra.gmra.mxu1 %vm302_vm7, %v2712_v58  ;;  %v1258_v62 = vsel %vm296_vm5, %v1257_v32, %v1256_v55  ;;  %v1364_v63 = vsel %vm284_vm1, %v1363_v49, %v1362_v56  ;;  %v1610_v0 = vld [vmem:[%s2647_s4 + $0x1e] sm:$0x1]  ;;  %v1611_v1 = vld [vmem:[%s2647_s4 + $0x26] sm:$0x1]  ;;  %v1612_v2 = vld [vmem:[%s2647_s4 + $0x2e] sm:$0x1] }
  0x51   : > { %v1260_v3 = vsel %vm299_vm6, %v1259_v33, %v1258_v62  ;;  %v1366_v4 = vsel %vm287_vm2, %v1365_v51, %v1364_v63  ;;  %2332 = vmatprep.mubr.msk.f32.mxu1 %vm302_vm7, %v2668_v20  ;;  %v1613_v6 = vld [vmem:[%s2647_s4 + $0x36] sm:$0x1]  ;;  %v1614_v7 = vld [vmem:[%s2647_s4 + $0x3e] sm:$0x1]  ;;  %v1623_v8 = vrot.slane %v1608_v60, 7  ;;  %v1625_v9 = vrot.slane %v1609_v61, 6 }
  0x52   : > { %2325 = vmatprep.subr.mxu0 %v1260_v3  ;;  %v1368_v10 = vsel %vm290_vm3, %v1367_v52, %v1366_v4  ;;  %v1627_v11 = vrot.slane %v1610_v0, 5  ;;  %v1629_v12 = vrot.slane %v1611_v1, 4  ;;  %v1631_v13 = vrot.slane %v1612_v2, 3  ;;  %v1597_v14 = vld [vmem:[%s2647_s4 + $0x5] sm:$0x1] }
  0x53   : > { %2326 = vmatpush3.msra.mxu0 %v1260_v3  ;;  %v1370_v15 = vsel %vm293_vm4, %v1369_v53, %v1368_v10  ;;  %v1624_v16 = vsel %vm281_vm0, %v1623_v8, %v1607_v54  ;;  %v1633_v17 = vrot.slane %v1613_v6, 2  ;;  %v1635_v18 = vrot.slane %v1614_v7, 1  ;;  %v1598_v19 = vld [vmem:[%s2647_s4 + $0xd] sm:$0x1]  ;;  %v1599_v21 = vld [vmem:[%s2647_s4 + $0x15] sm:$0x1] }
  0x54   : > { %v1372_v22 = vsel %vm296_vm5, %v1371_v57, %v1370_v15  ;;  %2328 = vmatmul.mubr.msk.f32.vlgmr.msra.gmra.mxu0 %vm302_vm7, %v2766_v44  ;;  %v1626_v23 = vsel %vm284_vm1, %v1625_v9, %v1624_v16  ;;  %v1600_v24 = vld [vmem:[%s2647_s4 + $0x1d] sm:$0x1]  ;;  %v1601_v25 = vld [vmem:[%s2647_s4 + $0x25] sm:$0x1]  ;;  %v1602_v26 = vld [vmem:[%s2647_s4 + $0x2d] sm:$0x1] }
  0x55   : > { %v1374_v27 = vsel %vm299_vm6, %v1373_v59, %v1372_v22  ;;  %v1628_v28 = vsel %vm287_vm2, %v1627_v11, %v1626_v23  ;;  %v1603_v29 = vld [vmem:[%s2647_s4 + $0x35] sm:$0x1]  ;;  %v1604_v30 = vld [vmem:[%s2647_s4 + $0x3d] sm:$0x1]  ;;  %v1727_v31 = vrot.slane %v1598_v19, 7  ;;  %v1729_v32 = vrot.slane %v1599_v21, 6  ;;  %2337 = vmatprep.mubr.msk.f32.mxu0 %vm302_vm7, %v2683_v34 }
  0x56   : > { %2330 = vmatprep.subr.mxu1 %v1374_v27  ;;  %v1630_v33 = vsel %vm290_vm3, %v1629_v12, %v1628_v28  ;;  %v1731_v35 = vrot.slane %v1600_v24, 5  ;;  %v1733_v36 = vrot.slane %v1601_v25, 4  ;;  %v1735_v37 = vrot.slane %v1602_v26, 3  ;;  %v1825_v38 = vld [vmem:[%s2647_s4 + $0x7] sm:$0x1] }
  0x57   : > { %2331 = vmatpush3.msra.mxu1 %v1374_v27  ;;  %v1632_v40 = vsel %vm293_vm4, %v1631_v13, %v1630_v33  ;;  %v1728_v41 = vsel %vm281_vm0, %v1727_v31, %v1597_v14  ;;  %v1737_v42 = vrot.slane %v1603_v29, 2  ;;  %v1739_v43 = vrot.slane %v1604_v30, 1  ;;  %v1826_v45 = vld [vmem:[%s2647_s4 + $0xf] sm:$0x1]  ;;  %v1827_v34 = vld [vmem:[%s2647_s4 + $0x17] sm:$0x1] }
  0x58   : > { %2333 = vmatmul.mubr.msk.f32.vlgmr.msra.gmra.mxu1 %vm302_vm7, %v2692_v39  ;;  %v1634_v46 = vsel %vm296_vm5, %v1633_v17, %v1632_v40  ;;  %v1730_v47 = vsel %vm284_vm1, %v1729_v32, %v1728_v41  ;;  %v1828_v48 = vld [vmem:[%s2647_s4 + $0x1f] sm:$0x1]  ;;  %v1829_v49 = vld [vmem:[%s2647_s4 + $0x27] sm:$0x1]  ;;  %v1830_v50 = vld [vmem:[%s2647_s4 + $0x2f] sm:$0x1]  ;;  %v508_v11 = vlaneseq }
  0x59   : > { %v1636_v51 = vsel %vm299_vm6, %v1635_v18, %v1634_v46  ;;  %v1732_v52 = vsel %vm287_vm2, %v1731_v35, %v1730_v47  ;;  %2342 = vmatprep.mubr.msk.f32.mxu1 %vm302_vm7, %v2724_v5  ;;  %v1831_v53 = vld [vmem:[%s2647_s4 + $0x37] sm:$0x1]  ;;  %v1841_v54 = vrot.slane %v1826_v45, 7  ;;  %v1843_v55 = vrot.slane %v1827_v34, 6  ;;  %v1832_v57 = vld [vmem:[%s2647_s4 + $0x3f] sm:$0x1] }
  0x5a   : > { %2335 = vmatprep.subr.mxu0 %v1636_v51  ;;  %v1734_v56 = vsel %vm290_vm3, %v1733_v36, %v1732_v52  ;;  %v1845_v59 = vrot.slane %v1828_v48, 5  ;;  %v1847_v60 = vrot.slane %v1829_v49, 4  ;;  %v1849_v63 = vrot.slane %v1830_v50, 3  ;;  %s2916_s4 = scalar_lea.vmem [#allocation5], %s2215_s29  ;;  %s2261_s29 = sshll.u32 %s2519_s15, 10 }
  0x5b   : > { %2336 = vmatpush3.msra.mxu0 %v1636_v51  ;;  %v1736_v61 = vsel %vm293_vm4, %v1735_v37, %v1734_v56  ;;  %v1842_v62 = vsel %vm281_vm0, %v1841_v54, %v1825_v38  ;;  %v1851_v1 = vrot.slane %v1831_v53, 2  ;;  %v1853_v4 = vrot.slane %v1832_v57, 1  ;;  %s2091_s6 = sshll.u32 %s2916_s4, 4  ;;  %s3089_s8 = scalar_lea.hbm %s3150_s3, %s2261_s29  ;;  %s3091_s6 = int_to_ptr.vmem [resolvable:$true] %s2091_s6 }
  0x5c   : > { %v1738_v0 = vsel %vm296_vm5, %v1737_v42, %v1736_v61  ;;  %2338 = vmatmul.mubr.msk.f32.vlgmr.msra.gmra.mxu0 %vm302_vm7, %v2712_v58  ;;  %v1844_v5 = vsel %vm284_vm1, %v1843_v55, %v1842_v62  ;;  %v509_v14 = vshrl.u32 %v508_v11, 7  ;;  %s2447_s10 = scalar_lea.vmem %s3091_s6, 1024  ;;  %p2454_p1 = scmp.lt.s32.totalorder %s3091_s6, %s2452_s18 }
  0x5d   : > { %v1740_v2 = vsel %vm299_vm6, %v1739_v43, %v1738_v0  ;;  %v1846_v3 = vsel %vm287_vm2, %v1845_v59, %v1844_v5  ;;  %2347 = vmatprep.mubr.msk.f32.mxu0 %vm302_vm7, %v2668_v20  ;;  %v2533_v20 = vmov 1966171168   ;;  %p2448_p8 = scmp.ne.s32.totalorder %s3091_s6, %s2447_s10  ;;  %p2455_p3 = scmp.lt.s32.totalorder %s2453_s19, %s2447_s10 }
  0x5e   : > { %2340 = vmatprep.subr.mxu1 %v1740_v2  ;;  %v1848_v6 = vsel %vm290_vm3, %v1847_v60, %v1846_v3  ;;  %v506_v10 = vunpack.c.l.s4 %v2533_v20 }
  0x5f   : > { %2341 = vmatpush3.msra.mxu1 %v1740_v2  ;;  %v1850_v7 = vsel %vm293_vm4, %v1849_v63, %v1848_v6  ;;  %p2449_p12 = pnand %p2448_p8, %p2608_p9  ;;  %p2456_p5 = por %p2455_p3, %p2454_p1 }
  0x60   : > { %2343 = vmatmul.mubr.msk.f32.vlgmr.msra.gmra.mxu1 %vm302_vm7, %v2766_v44  ;;  %v1852_v58 = vsel %vm296_vm5, %v1851_v1, %v1850_v7  ;;  %v507_v13 = vunpack.c.0.s8 %v506_v10 }
  0x61   : > { %v1854_v8 = vsel %vm299_vm6, %v1853_v4, %v1852_v58  ;;  %p2450_p0 = pneg %p2449_p12 }
  0x62   : > { %2345 = vmatprep.subr.mxu0 %v1854_v8  ;;  %v2902_v21 = vsub.s32 %v507_v13, %v509_v14 }
  0x63   : > { %2346 = vmatpush3.msra.mxu0 %v1854_v8  ;;  %p2457_p6 = pnand %p2456_p5, %p2450_p0 }
  0x64   : > { %2348 = vmatmul.mubr.msk.f32.vlgmr.msra.gmra.mxu0 %vm302_vm7, %v2692_v39 }
  0xb1   : > { %v2898_v9 = vpop.permute.xlu0 %490 }
  0xb5   : > { %v2900_v15 = vpop.permute.xlu0 %495 }
  0xfb   : > { %v2299_v12 = vpop.f32.mrf.mxu0 }
  0xfd   : > { %v375_v16 = vpop.f32.mrf.mxu0 }
  0xff   : > { %v2304_v44 = vpop.f32.mrf.mxu1 }
 0x100   : > { %v485_v17 = vadd.f32 %v2304_v44, %v2299_v12 }
 0x101   : > { %v479_v18 = vpop.f32.mrf.mxu1 }
 0x102   : > { %v480_v19 = vadd.f32 %v479_v18, %v375_v16  ;;  %v499_v22 = vadd.f32 %v2900_v15, %v485_v17 }
 0x104   : > { %v498_v39 = vadd.f32 %v2898_v9, %v480_v19  ;;  %v501_v23 = vmax.f32 %v499_v22, 0.0  ;;  %v2309_v24 = vpop.f32.mrf.mxu0 }
 0x106   : > { %v500_v25 = vmax.f32 %v498_v39, 0.0  ;;  %v553_v26 = vcombine.high %v501_v23, %v501_v23  ;;  %v560_v27 = vrot.slane %v501_v23, %v2902_v21  ;;  %v750_v29 = vpop.f32.mrf.mxu0 }
 0x107   : > { %v2314_v28 = vpop.f32.mrf.mxu1 }
 0x108   : > { %v504_v30 = vcombine.high %v500_v25, %v500_v25  ;;  %v511_v31 = vrot.slane %v500_v25, %v2902_v21  ;;  %v567_v32 = vrot.slane %v553_v26, %v2902_v21  ;;  %v568_v33 = vcombine.high %v560_v27, %v560_v27 }
 0x109   : > { %v576_v35 = vrot.slane %v560_v27, %v2902_v21  ;;  %v860_v36 = vadd.f32 %v2314_v28, %v2309_v24  ;;  %v854_v37 = vpop.f32.mrf.mxu1 }
 0x10a   : > { %v518_v38 = vrot.slane %v504_v30, %v2902_v21  ;;  %v519_v40 = vcombine.high %v511_v31, %v511_v31  ;;  %v527_v41 = vrot.slane %v511_v31, %v2902_v21  ;;  %v569_v42 = vcombine.high %v567_v32, %v567_v32 }
 0x10b   : > { %v583_v43 = vrot.slane %v567_v32, %v2902_v21  ;;  %v590_v45 = vrot.slane %v568_v33, %v2902_v21  ;;  %v598_v34 = vcombine.high %v576_v35, %v576_v35  ;;  %627 = vst.msk [vmem:[%s2916_s4 + $0x20] sm:$0x1] %vm618_vm8, %v576_v35  ;;  %v855_v46 = vadd.f32 %v854_v37, %v750_v29  ;;  %v2319_v47 = vpop.f32.mrf.mxu0 }
 0x10c   : > { %v520_v48 = vcombine.high %v518_v38, %v518_v38  ;;  %v534_v49 = vrot.slane %v518_v38, %v2902_v21  ;;  %v541_v50 = vrot.slane %v519_v40, %v2902_v21  ;;  %v549_v51 = vcombine.high %v527_v41, %v527_v41  ;;  %619 = vst.msk [vmem:[%s2916_s4] sm:$0x1] %vm618_vm8, %v527_v41 }
 0x10d   : > { %v597_v52 = vrot.slane %v569_v42, %v2902_v21  ;;  %v599_v53 = vcombine.high %v583_v43, %v583_v43  ;;  %v600_v54 = vcombine.high %v590_v45, %v590_v45  ;;  %628 = vst.msk [vmem:[%s2916_s4 + $0x24] sm:$0x1] %vm618_vm8, %v590_v45  ;;  %629 = vst.msk [vmem:[%s2916_s4 + $0x28] sm:$0x1] %vm618_vm8, %v598_v34  ;;  %v968_v56 = vpop.f32.mrf.mxu0 }
 0x10e   : > { %631 = vst.msk [vmem:[%s2916_s4 + $0x30] sm:$0x1] %vm618_vm8, %v583_v43  ;;  %v978_v55 = vadd.f32 %v2319_v47, %v860_v36  ;;  %v548_v57 = vrot.slane %v520_v48, %v2902_v21  ;;  %v550_v59 = vcombine.high %v534_v49, %v534_v49  ;;  %v551_v60 = vcombine.high %v541_v50, %v541_v50 }
 0x10f   : > { %620 = vst.msk [vmem:[%s2916_s4 + $0x4] sm:$0x1] %vm618_vm8, %v541_v50  ;;  %621 = vst.msk [vmem:[%s2916_s4 + $0x8] sm:$0x1] %vm618_vm8, %v549_v51  ;;  %v977_v61 = vadd.f32 %v968_v56, %v855_v46  ;;  %v601_v62 = vcombine.high %v597_v52, %v597_v52 }
 0x110   : > { %623 = vst.msk [vmem:[%s2916_s4 + $0x10] sm:$0x1] %vm618_vm8, %v534_v49  ;;  %630 = vst.msk [vmem:[%s2916_s4 + $0x2c] sm:$0x1] %vm618_vm8, %v600_v54  ;;  %v980_v63 = vadd.f32 %v978_v55, %v2900_v15  ;;  %v552_v0 = vcombine.high %v548_v57, %v548_v57  ;;  %v2324_v5 = vpop.f32.mrf.mxu1 }
 0x111   : > { %632 = vst.msk [vmem:[%s2916_s4 + $0x34] sm:$0x1] %vm618_vm8, %v597_v52  ;;  %633 = vst.msk [vmem:[%s2916_s4 + $0x38] sm:$0x1] %vm618_vm8, %v599_v53  ;;  %v979_v1 = vadd.f32 %v977_v61, %v2898_v9 }
 0x112   : > { %622 = vst.msk [vmem:[%s2916_s4 + $0xc] sm:$0x1] %vm618_vm8, %v551_v60  ;;  %624 = vst.msk [vmem:[%s2916_s4 + $0x14] sm:$0x1] %vm618_vm8, %v548_v57  ;;  %v982_v2 = vmax.f32 %v980_v63, 0.0  ;;  %v1230_v8 = vpop.f32.mrf.mxu1 }
 0x113   : > { %625 = vst.msk [vmem:[%s2916_s4 + $0x18] sm:$0x1] %vm618_vm8, %v550_v59  ;;  %634 = vst.msk [vmem:[%s2916_s4 + $0x3c] sm:$0x1] %vm618_vm8, %v601_v62  ;;  %v981_v3 = vmax.f32 %v979_v1, 0.0 }
 0x114   : > { %626 = vst.msk [vmem:[%s2916_s4 + $0x1c] sm:$0x1] %vm618_vm8, %v552_v0  ;;  %v1034_v4 = vcombine.high %v982_v2, %v982_v2  ;;  %v1041_v6 = vrot.slane %v982_v2, %v2902_v21  ;;  %v2329_v20 = vpop.f32.mrf.mxu0 }
 0x115   : > { %v985_v7 = vcombine.high %v981_v3, %v981_v3  ;;  %v992_v58 = vrot.slane %v981_v3, %v2902_v21  ;;  %v1340_v13 = vadd.f32 %v2329_v20, %v2324_v5 }
 0x116   : > { %v1048_v10 = vrot.slane %v1034_v4, %v2902_v21  ;;  %v1049_v11 = vcombine.high %v1041_v6, %v1041_v6  ;;  %v1057_v12 = vrot.slane %v1041_v6, %v2902_v21  ;;  %v1334_v39 = vpop.f32.mrf.mxu0 }
 0x117   : > { %v999_v14 = vrot.slane %v985_v7, %v2902_v21  ;;  %v1000_v44 = vcombine.high %v992_v58, %v992_v58  ;;  %v1008_v16 = vrot.slane %v992_v58, %v2902_v21  ;;  %v1335_v36 = vadd.f32 %v1334_v39, %v1230_v8 }
 0x118   : > { %v1050_v17 = vcombine.high %v1048_v10, %v1048_v10  ;;  %v1064_v18 = vrot.slane %v1048_v10, %v2902_v21  ;;  %v1071_v19 = vrot.slane %v1049_v11, %v2902_v21  ;;  %v1079_v22 = vcombine.high %v1057_v12, %v1057_v12  ;;  %1107 = vst.msk [vmem:[%s2916_s4 + $0x21] sm:$0x1] %vm618_vm8, %v1057_v12  ;;  %v2334_v27 = vpop.f32.mrf.mxu1 }
 0x119   : > { %v1001_v23 = vcombine.high %v999_v14, %v999_v14  ;;  %v1015_v24 = vrot.slane %v999_v14, %v2902_v21  ;;  %v1022_v25 = vrot.slane %v1000_v44, %v2902_v21  ;;  %v1030_v26 = vcombine.high %v1008_v16, %v1008_v16  ;;  %1099 = vst.msk [vmem:[%s2916_s4 + $0x1] sm:$0x1] %vm618_vm8, %v1008_v16 }
 0x11a   : > { %v1078_v28 = vrot.slane %v1050_v17, %v2902_v21  ;;  %v1080_v29 = vcombine.high %v1064_v18, %v1064_v18  ;;  %v1081_v30 = vcombine.high %v1071_v19, %v1071_v19  ;;  %1108 = vst.msk [vmem:[%s2916_s4 + $0x25] sm:$0x1] %vm618_vm8, %v1071_v19  ;;  %1109 = vst.msk [vmem:[%s2916_s4 + $0x29] sm:$0x1] %vm618_vm8, %v1079_v22  ;;  %v1448_v40 = vpop.f32.mrf.mxu1 }
 0x11b   : > { %1111 = vst.msk [vmem:[%s2916_s4 + $0x31] sm:$0x1] %vm618_vm8, %v1064_v18  ;;  %v1458_v31 = vadd.f32 %v2334_v27, %v1340_v13  ;;  %v1029_v32 = vrot.slane %v1001_v23, %v2902_v21  ;;  %v1031_v33 = vcombine.high %v1015_v24, %v1015_v24  ;;  %v1032_v35 = vcombine.high %v1022_v25, %v1022_v25 }
 0x11c   : > { %1100 = vst.msk [vmem:[%s2916_s4 + $0x5] sm:$0x1] %vm618_vm8, %v1022_v25  ;;  %1101 = vst.msk [vmem:[%s2916_s4 + $0x9] sm:$0x1] %vm618_vm8, %v1030_v26  ;;  %v1082_v37 = vcombine.high %v1078_v28, %v1078_v28  ;;  %v1457_v42 = vadd.f32 %v1448_v40, %v1335_v36  ;;  %v2339_v43 = vpop.f32.mrf.mxu0 }
 0x11d   : > { %1103 = vst.msk [vmem:[%s2916_s4 + $0x11] sm:$0x1] %vm618_vm8, %v1015_v24  ;;  %1110 = vst.msk [vmem:[%s2916_s4 + $0x2d] sm:$0x1] %vm618_vm8, %v1081_v30  ;;  %v1460_v38 = vadd.f32 %v1458_v31, %v2900_v15  ;;  %v1033_v41 = vcombine.high %v1029_v32, %v1029_v32 }
 0x11e   : > { %1112 = vst.msk [vmem:[%s2916_s4 + $0x35] sm:$0x1] %vm618_vm8, %v1078_v28  ;;  %1113 = vst.msk [vmem:[%s2916_s4 + $0x39] sm:$0x1] %vm618_vm8, %v1080_v29  ;;  %v1459_v34 = vadd.f32 %v1457_v42, %v2898_v9  ;;  %v1710_v50 = vpop.f32.mrf.mxu0 }
 0x11f   : > { %1102 = vst.msk [vmem:[%s2916_s4 + $0xd] sm:$0x1] %vm618_vm8, %v1032_v35  ;;  %1104 = vst.msk [vmem:[%s2916_s4 + $0x15] sm:$0x1] %vm618_vm8, %v1029_v32  ;;  %v1462_v45 = vmax.f32 %v1460_v38, 0.0 }
 0x120   : > { %1105 = vst.msk [vmem:[%s2916_s4 + $0x19] sm:$0x1] %vm618_vm8, %v1031_v33  ;;  %1114 = vst.msk [vmem:[%s2916_s4 + $0x3d] sm:$0x1] %vm618_vm8, %v1082_v37  ;;  %v1461_v48 = vmax.f32 %v1459_v34, 0.0  ;;  %v2344_v49 = vpop.f32.mrf.mxu1 }
 0x121   : > { %1106 = vst.msk [vmem:[%s2916_s4 + $0x1d] sm:$0x1] %vm618_vm8, %v1033_v41  ;;  %v1514_v46 = vcombine.high %v1462_v45, %v1462_v45  ;;  %v1521_v47 = vrot.slane %v1462_v45, %v2902_v21  ;;  %v1820_v56 = vadd.f32 %v2344_v49, %v2339_v43 }
 0x122   : > { %v1465_v54 = vcombine.high %v1461_v48, %v1461_v48  ;;  %v1472_v55 = vrot.slane %v1461_v48, %v2902_v21  ;;  %v1814_v57 = vpop.f32.mrf.mxu1 }
 0x123   : > { %v1528_v51 = vrot.slane %v1514_v46, %v2902_v21  ;;  %v1529_v52 = vcombine.high %v1521_v47, %v1521_v47  ;;  %v1537_v53 = vrot.slane %v1521_v47, %v2902_v21  ;;  %v1815_v1 = vadd.f32 %v1814_v57, %v1710_v50 }
 0x124   : > { %v1479_v63 = vrot.slane %v1465_v54, %v2902_v21  ;;  %v1480_v0 = vcombine.high %v1472_v55, %v1472_v55  ;;  %v1488_v5 = vrot.slane %v1472_v55, %v2902_v21  ;;  %v2349_v2 = vpop.f32.mrf.mxu0 }
 0x125   : > { %v1530_v59 = vcombine.high %v1528_v51, %v1528_v51  ;;  %v1544_v60 = vrot.slane %v1528_v51, %v2902_v21  ;;  %v1551_v61 = vrot.slane %v1529_v52, %v2902_v21  ;;  %v1559_v62 = vcombine.high %v1537_v53, %v1537_v53  ;;  %1587 = vst.msk [vmem:[%s2916_s4 + $0x22] sm:$0x1] %vm618_vm8, %v1537_v53 }
 0x126   : > { %v1938_v7 = vadd.f32 %v2349_v2, %v1820_v56  ;;  %v1481_v58 = vcombine.high %v1479_v63, %v1479_v63  ;;  %v1495_v8 = vrot.slane %v1479_v63, %v2902_v21  ;;  %v1502_v20 = vrot.slane %v1480_v0, %v2902_v21  ;;  %1579 = vst.msk [vmem:[%s2916_s4 + $0x2] sm:$0x1] %vm618_vm8, %v1488_v5  ;;  %v1928_v11 = vpop.f32.mrf.mxu0 }
 0x127   : > { %v1558_v3 = vrot.slane %v1530_v59, %v2902_v21  ;;  %v1560_v4 = vcombine.high %v1544_v60, %v1544_v60  ;;  %v1561_v6 = vcombine.high %v1551_v61, %v1551_v61  ;;  %1588 = vst.msk [vmem:[%s2916_s4 + $0x26] sm:$0x1] %vm618_vm8, %v1551_v61  ;;  %1589 = vst.msk [vmem:[%s2916_s4 + $0x2a] sm:$0x1] %vm618_vm8, %v1559_v62 }
 0x128   : > { %1591 = vst.msk [vmem:[%s2916_s4 + $0x32] sm:$0x1] %vm618_vm8, %v1544_v60  ;;  %v1510_v10 = vcombine.high %v1488_v5, %v1488_v5  ;;  %v1940_v13 = vadd.f32 %v1938_v7, %v2900_v15  ;;  %v1937_v14 = vadd.f32 %v1928_v11, %v1815_v1  ;;  %v1509_v44 = vrot.slane %v1481_v58, %v2902_v21 }
 0x129   : > { %v1562_v12 = vcombine.high %v1558_v3, %v1558_v3  ;;  %1590 = vst.msk [vmem:[%s2916_s4 + $0x2e] sm:$0x1] %vm618_vm8, %v1561_v6  ;;  %1592 = vst.msk [vmem:[%s2916_s4 + $0x36] sm:$0x1] %vm618_vm8, %v1558_v3  ;;  %v1511_v16 = vcombine.high %v1495_v8, %v1495_v8  ;;  %v1512_v17 = vcombine.high %v1502_v20, %v1502_v20 }
 0x12a   : > { %1593 = vst.msk [vmem:[%s2916_s4 + $0x3a] sm:$0x1] %vm618_vm8, %v1560_v4  ;;  %1580 = vst.msk [vmem:[%s2916_s4 + $0x6] sm:$0x1] %vm618_vm8, %v1502_v20  ;;  %v1942_v18 = vmax.f32 %v1940_v13, 0.0  ;;  %v1939_v19 = vadd.f32 %v1937_v14, %v2898_v9  ;;  %v1513_v22 = vcombine.high %v1509_v44, %v1509_v44 }
 0x12b   : > { %1581 = vst.msk [vmem:[%s2916_s4 + $0xa] sm:$0x1] %vm618_vm8, %v1510_v10  ;;  %1583 = vst.msk [vmem:[%s2916_s4 + $0x12] sm:$0x1] %vm618_vm8, %v1495_v8 }
 0x12c   : > { %1594 = vst.msk [vmem:[%s2916_s4 + $0x3e] sm:$0x1] %vm618_vm8, %v1562_v12  ;;  %1582 = vst.msk [vmem:[%s2916_s4 + $0xe] sm:$0x1] %vm618_vm8, %v1512_v17  ;;  %v1994_v15 = vcombine.high %v1942_v18, %v1942_v18  ;;  %v2001_v39 = vrot.slane %v1942_v18, %v2902_v21  ;;  %v1941_v23 = vmax.f32 %v1939_v19, 0.0 }
 0x12d   : > { %1584 = vst.msk [vmem:[%s2916_s4 + $0x16] sm:$0x1] %vm618_vm8, %v1509_v44  ;;  %1585 = vst.msk [vmem:[%s2916_s4 + $0x1a] sm:$0x1] %vm618_vm8, %v1511_v16 }
 0x12e   : > { %1586 = vst.msk [vmem:[%s2916_s4 + $0x1e] sm:$0x1] %vm618_vm8, %v1513_v22  ;;  %v2008_v24 = vrot.slane %v1994_v15, %v2902_v21  ;;  %v2009_v25 = vcombine.high %v2001_v39, %v2001_v39  ;;  %v2017_v9 = vrot.slane %v2001_v39, %v2902_v21  ;;  %v1945_v26 = vcombine.high %v1941_v23, %v1941_v23 }
 0x12f   : > { %v1952_v27 = vrot.slane %v1941_v23, %v2902_v21 }
 0x130   : > { %v2010_v28 = vcombine.high %v2008_v24, %v2008_v24  ;;  %v2024_v29 = vrot.slane %v2008_v24, %v2902_v21  ;;  %v2031_v30 = vrot.slane %v2009_v25, %v2902_v21  ;;  %v2039_v31 = vcombine.high %v2017_v9, %v2017_v9  ;;  %2067 = vst.msk [vmem:[%s2916_s4 + $0x23] sm:$0x1] %vm618_vm8, %v2017_v9 }
 0x131   : > { %v1959_v32 = vrot.slane %v1945_v26, %v2902_v21  ;;  %v1960_v33 = vcombine.high %v1952_v27, %v1952_v27  ;;  %v1968_v35 = vrot.slane %v1952_v27, %v2902_v21 }
 0x132   : > { %v2038_v36 = vrot.slane %v2010_v28, %v2902_v21  ;;  %v2040_v37 = vcombine.high %v2024_v29, %v2024_v29  ;;  %v2041_v38 = vcombine.high %v2031_v30, %v2031_v30  ;;  %2068 = vst.msk [vmem:[%s2916_s4 + $0x27] sm:$0x1] %vm618_vm8, %v2031_v30  ;;  %2069 = vst.msk [vmem:[%s2916_s4 + $0x2b] sm:$0x1] %vm618_vm8, %v2039_v31 }
 0x133   : > { %2071 = vst.msk [vmem:[%s2916_s4 + $0x33] sm:$0x1] %vm618_vm8, %v2024_v29  ;;  %v1961_v40 = vcombine.high %v1959_v32, %v1959_v32  ;;  %v1975_v41 = vrot.slane %v1959_v32, %v2902_v21  ;;  %v1982_v42 = vrot.slane %v1960_v33, %v2902_v21  ;;  %v1990_v43 = vcombine.high %v1968_v35, %v1968_v35 }
 0x134   : > { %2059 = vst.msk [vmem:[%s2916_s4 + $0x3] sm:$0x1] %vm618_vm8, %v1968_v35  ;;  %v2042_v45 = vcombine.high %v2038_v36, %v2038_v36  ;;  %2070 = vst.msk [vmem:[%s2916_s4 + $0x2f] sm:$0x1] %vm618_vm8, %v2041_v38 }
 0x135   : > { %2072 = vst.msk [vmem:[%s2916_s4 + $0x37] sm:$0x1] %vm618_vm8, %v2038_v36  ;;  %2073 = vst.msk [vmem:[%s2916_s4 + $0x3b] sm:$0x1] %vm618_vm8, %v2040_v37  ;;  %v1989_v34 = vrot.slane %v1961_v40, %v2902_v21  ;;  %v1991_v46 = vcombine.high %v1975_v41, %v1975_v41  ;;  %v1992_v47 = vcombine.high %v1982_v42, %v1982_v42 }
 0x136   : > { %2060 = vst.msk [vmem:[%s2916_s4 + $0x7] sm:$0x1] %vm618_vm8, %v1982_v42  ;;  %2061 = vst.msk [vmem:[%s2916_s4 + $0xb] sm:$0x1] %vm618_vm8, %v1990_v43 }
 0x137   : > { %2063 = vst.msk [vmem:[%s2916_s4 + $0x13] sm:$0x1] %vm618_vm8, %v1975_v41  ;;  %2074 = vst.msk [vmem:[%s2916_s4 + $0x3f] sm:$0x1] %vm618_vm8, %v2042_v45  ;;  %v1993_v21 = vcombine.high %v1989_v34, %v1989_v34 }
 0x138   : > { %2062 = vst.msk [vmem:[%s2916_s4 + $0xf] sm:$0x1] %vm618_vm8, %v1992_v47  ;;  %2064 = vst.msk [vmem:[%s2916_s4 + $0x17] sm:$0x1] %vm618_vm8, %v1989_v34 }
 0x139   : > { %2065 = vst.msk [vmem:[%s2916_s4 + $0x1b] sm:$0x1] %vm618_vm8, %v1991_v46  ;;  %2066 = vst.msk [vmem:[%s2916_s4 + $0x1f] sm:$0x1] %vm618_vm8, %v1993_v21 }
 0x13a   : > { %2460 = shalt.err (!%p2457_p6)
}
 0x13b   : > { %s2461_s21 = scalar_lea.hbm %s3089_s8, 1024  ;;  %s2465_s30 = scalar_lea.hbm %s3150_s3, 2048 }
 0x13c   : > { %p2462_p7 = scmp.ne.s32.totalorder %s3089_s8, %s2461_s21  ;;  %p2466_p13 = scmp.lt.s32.totalorder %s3089_s8, %s3150_s3 }
 0x13d   : > { %p2467_p2 = scmp.lt.s32.totalorder %s2465_s30, %s2461_s21 }
 0x13e   : > { %p2463_p10 = pnand %p2462_p7, %p2608_p9 }
 0x13f   : > { %p2468_p8 = por %p2467_p2, %p2466_p13 }
 0x140   : > { %p2464_p4 = pneg %p2463_p10 }
 0x142   : > { %p2469_p12 = pnand %p2468_p8, %p2464_p4 }
 0x144   : > { %2472 = shalt.err (!%p2469_p12)
}
 0x145   : > { %s2535_s4 = smov 64   ;;  %s2536_s29 = smov 4  }
 0x146   : > { %2352 = dma.vmem_to_hbm [thread:$0]  (%p2608_p9), %s3091_s6, 1024, %s3089_s8, %s2076_s9, %s2535_s4, %s2535_s4, %s2536_s29  }
 0x147 PF: > { %s2106_s15 = sand.u32 1, %s2507_s12   ;;  %p3156_p0 = scmp.ge.s32.totalorder %s2527_s17, 2 }
 0x148   : > { %s2107_s7 = scalar_lea.sflag [#allocation4], %s2106_s15 }
 0x149   : > { %p2359_p1 = pnand %p3156_p0, %p2615_p11 }
 0x14b   : > { %p2360_p3 = pneg %p2359_p1 }
 0x14d   : > { %2502 = dma.done.wait (%p2360_p3), %s2107_s7, 1024  }
 0x14e   : > { %2504 = vsyncadd (%p2360_p3), %s2107_s7, 4294966272  ;;  %s19_s17 = sadd.s32 1, %s2527_s17   ;;  %s3157_s12 = smov %s2511_s13 }
 0x14f   : > { %p16_p5 = scmp.ge.s32.totalorder %s19_s17, 4   ;;  %s3158_s13 = smov %s2515_s14 }
 0x150   : > { %s3159_s14 = smov %s2613_s26  ;;  %s3160_s15 = smov %s2523_s16 }
 0x151   : > { %s3161_s16 = smov %s3163_s20  ;;  %18 = sbr.rel (!%p16_p5) target bundleno = 6 (0x6), region = 85 }
 0x156   :  { %2112 = vsyncpa [#allocation3], 1 }
 0x157   :  { %2114 = vsyncpa [#allocation3 + $0x1], 1 }
 0x158   :  { %2115 = vsyncpa [#allocation4], 1 }
 0x159   :  { %2117 = vsyncpa [#allocation4 + $0x1], 1 }

</bundles_post_ra>
